<compile_context>
chip_gen: v7x
topology: tpu7x:2x2x1
jax: 0.10.0
libtpu: 0.0.40
codegen_flags: <defaults>
</compile_context>

<pallas_src>
import functools

import jax
import jax.numpy as jnp
from jax.experimental import pallas as pl
from jax.experimental.pallas import tpu as pltpu


def _round_up(n, m):
    return ((n + m - 1) // m) * m


# -----------------------------------------------------------------------------
# Fused kernel, grid = (B, n_chunks):
#   p_ref   : (1, CHUNK, 9*C)   im2col patches for batch b, row-chunk c
#   wc_ref  : (9*C, F_pad)      conv weights (tap-major, channel-minor)
#   cb_ref  : (1, F_pad)        conv bias (zero-padded)
#   w1_ref  : (F_pad, 512)   b1_ref: (1, 512)      bottleneck_fc
#   w2_ref  : (512, NC_pad)  b2_ref: (1, NC_pad)   classifier (zero-padded cols)
#   o_ref   : (1, 1, NC_pad)    logits for batch b (written on last chunk)
#   pooled_ref : VMEM (1, F_pad) f32   GAP partial-sum accumulator
# -----------------------------------------------------------------------------
def _fused_kernel(p_ref, wc_ref, cb_ref, w1_ref, b1_ref, w2_ref, b2_ref,
                  o_ref, pooled_ref, *, n_pad_rows, inv_hw):
    c = pl.program_id(1)

    @pl.when(c == 0)
    def _():
        pooled_ref[...] = jnp.zeros_like(pooled_ref)

    # conv3x3 as a single im2col matmul for this row chunk.
    conv = jnp.dot(p_ref[0], wc_ref[...], preferred_element_type=jnp.float32)
    act = jnp.maximum(conv + cb_ref[...], 0.0)                # bias + ReLU
    pooled_ref[...] += jnp.sum(act, axis=0, keepdims=True)    # partial GAP sum

    @pl.when(c == pl.num_programs(1) - 1)
    def _():
        pooled = pooled_ref[...]
        if n_pad_rows:
            # zero-padded patch rows each contributed relu(bias); subtract exactly.
            pooled = pooled - jnp.float32(n_pad_rows) * jnp.maximum(cb_ref[...], 0.0)
        pooled = pooled * jnp.float32(inv_hw)                  # GAP mean over H*W

        # bottleneck FC
        bott = jnp.dot(pooled, w1_ref[...],
                       preferred_element_type=jnp.float32) + b1_ref[...]   # (1, 512)
        # F.normalize(p=2, dim=1): x / max(||x||, 1e-12) == x * rsqrt(max(ss, 1e-24))
        ss = jnp.sum(bott * bott, axis=1, keepdims=True)
        normed = bott * jax.lax.rsqrt(jnp.maximum(ss, 1e-24))
        # classifier
        o_ref[0] = (jnp.dot(normed, w2_ref[...],
                            preferred_element_type=jnp.float32) + b2_ref[...])


def init_params(key, in_ch=3, feature_dim=32, bottleneck=512, num_classes=10):
    k = jax.random.split(key, 6)
    scale = 0.05
    return {
        # backbone conv: 3x3, in_ch -> feature_dim, layout (kh, kw, cin, cout)
        "conv_w": scale * jax.random.normal(k[0], (3, 3, in_ch, feature_dim), jnp.float32),
        "conv_b": scale * jax.random.normal(k[1], (feature_dim,), jnp.float32),
        # bottleneck_fc: feature_dim -> 512
        "fc1_w": scale * jax.random.normal(k[2], (feature_dim, bottleneck), jnp.float32),
        "fc1_b": scale * jax.random.normal(k[3], (bottleneck,), jnp.float32),
        # classifier: 512 -> num_classes
        "fc2_w": scale * jax.random.normal(k[4], (bottleneck, num_classes), jnp.float32),
        "fc2_b": scale * jax.random.normal(k[5], (num_classes,), jnp.float32),
    }


@jax.jit
def timm_model_forward(params, x_nchw):
    """x_nchw: [B, C, H, W] float32 (PyTorch layout). Returns logits [B, NC]."""
    B, C, H, W = x_nchw.shape
    Fd = params["conv_w"].shape[-1]
    BOT = params["fc1_w"].shape[-1]
    NC = params["fc2_w"].shape[-1]
    F_pad = _round_up(Fd, 128)
    NC_pad = _round_up(NC, 128)
    HW = H * W
    K9C = 9 * C

    # ---- im2col layout plumbing (tiny: 9x blow-up of a small image) ----------
    x = jnp.transpose(x_nchw, (0, 2, 3, 1))                       # NHWC
    xp = jnp.pad(x, ((0, 0), (1, 1), (1, 1), (0, 0)))             # SAME zero-pad
    taps = [xp[:, di:di + H, dj:dj + W, :]
            for di in range(3) for dj in range(3)]                # tap-major
    patches = jnp.concatenate(taps, axis=-1).reshape(B, HW, K9C)  # (B, H*W, 9*C)

    # ---- row chunking (sublane-aligned, divides evenly) ----------------------
    if HW >= 128:
        HWp = _round_up(HW, 128)
        CHUNK = 128
    else:
        HWp = _round_up(HW, 8)
        CHUNK = HWp
    n_pad_rows = HWp - HW
    if n_pad_rows:
        patches = jnp.pad(patches, ((0, 0), (0, n_pad_rows), (0, 0)))
    n_chunks = HWp // CHUNK

    # ---- lane-pad the weights to 128-wide outputs -----------------------------
    wc = jnp.pad(params["conv_w"].reshape(K9C, Fd),
                 ((0, 0), (0, F_pad - Fd)))                       # (9C, F_pad)
    cb = jnp.pad(params["conv_b"], (0, F_pad - Fd)).reshape(1, F_pad)
    w1 = jnp.pad(params["fc1_w"], ((0, F_pad - Fd), (0, 0)))      # (F_pad, 512)
    b1 = params["fc1_b"].reshape(1, BOT)
    w2 = jnp.pad(params["fc2_w"], ((0, 0), (0, NC_pad - NC)))     # (512, NC_pad)
    b2 = jnp.pad(params["fc2_b"], (0, NC_pad - NC)).reshape(1, NC_pad)

    kernel = functools.partial(_fused_kernel,
                               n_pad_rows=n_pad_rows, inv_hw=1.0 / float(HW))

    out = pl.pallas_call(
        kernel,
        out_shape=jax.ShapeDtypeStruct((B, 1, NC_pad), jnp.float32),
        grid=(B, n_chunks),
        in_specs=[
            pl.BlockSpec((1, CHUNK, K9C), lambda b, c: (b, c, 0)),   # patches
            pl.BlockSpec((K9C, F_pad), lambda b, c: (0, 0)),         # conv w
            pl.BlockSpec((1, F_pad), lambda b, c: (0, 0)),           # conv b
            pl.BlockSpec((F_pad, BOT), lambda b, c: (0, 0)),         # fc1 w
            pl.BlockSpec((1, BOT), lambda b, c: (0, 0)),             # fc1 b
            pl.BlockSpec((BOT, NC_pad), lambda b, c: (0, 0)),        # fc2 w
            pl.BlockSpec((1, NC_pad), lambda b, c: (0, 0)),          # fc2 b
        ],
        out_specs=pl.BlockSpec((1, 1, NC_pad), lambda b, c: (b, 0, 0)),
        scratch_shapes=[pltpu.VMEM((1, F_pad), jnp.float32)],
        compiler_params=pltpu.CompilerParams(
            dimension_semantics=("parallel", "arbitrary")),
    )(patches, wc, cb, w1, b1, w2, b2)

    return out[:, 0, :NC]


def reference_forward(params, x_nchw):
    """Pure-JAX reference with identical semantics (for verification)."""
    B, C, H, W = x_nchw.shape
    x = jnp.transpose(x_nchw, (0, 2, 3, 1))
    xp = jnp.pad(x, ((0, 0), (1, 1), (1, 1), (0, 0)))
    conv = jnp.zeros((B, H, W, params["conv_w"].shape[-1]), jnp.float32)
    for di in range(3):
        for dj in range(3):
            conv = conv + jnp.einsum("bhwc,cf->bhwf",
                                     xp[:, di:di + H, dj:dj + W, :],
                                     params["conv_w"][di, dj])
    act = jnp.maximum(conv + params["conv_b"], 0.0)
    pooled = act.mean(axis=(1, 2))                                # GAP + flatten
    bott = pooled @ params["fc1_w"] + params["fc1_b"]
    norm = jnp.sqrt(jnp.sum(bott * bott, axis=1, keepdims=True))
    normed = bott / jnp.maximum(norm, 1e-12)                      # F.normalize
    return normed @ params["fc2_w"] + params["fc2_b"]


if __name__ == "__main__":
    key = jax.random.PRNGKey(0)
    k_param, k_input = jax.random.split(key)

    batch, in_ch, img_size = 2, 3, 16
    feature_dim, num_classes = 32, 10

    params = init_params(
        k_param, in_ch=in_ch, feature_dim=feature_dim,
        bottleneck=512, num_classes=num_classes,
    )
    x = jax.random.normal(k_input, (batch, in_ch, img_size, img_size), jnp.float32)

    logits = timm_model_forward(params, x)
    jax.block_until_ready(logits)

    assert logits.shape == (batch, num_classes), logits.shape
    assert bool(jnp.all(jnp.isfinite(logits)))

    ref = reference_forward(params, x)
    assert bool(jnp.allclose(logits, ref, atol=1e-3, rtol=1e-3)), (
        "mismatch vs reference", jnp.max(jnp.abs(logits - ref)))

    print("KERNEL_OK")
</pallas_src>

<mosaic_0001>
module attributes {stable_mosaic.version = 11 : i64} {
  func.func @_fused_kernel(%arg0: i32, %arg1: i32, %arg2: memref<1x128x27xf32, #tpu.memory_space<vmem>>, %arg3: memref<27x128xf32, #tpu.memory_space<vmem>>, %arg4: memref<1x128xf32, #tpu.memory_space<vmem>>, %arg5: memref<128x512xf32, #tpu.memory_space<vmem>>, %arg6: memref<1x512xf32, #tpu.memory_space<vmem>>, %arg7: memref<512x128xf32, #tpu.memory_space<vmem>>, %arg8: memref<1x128xf32, #tpu.memory_space<vmem>>, %arg9: memref<1x1x128xf32, #tpu.memory_space<vmem>>, %arg10: memref<1x128xf32, #tpu.memory_space<vmem>>) attributes {dimension_semantics = [#tpu.dimension_semantics<parallel>, #tpu.dimension_semantics<arbitrary>], iteration_bounds = array<i64: 2, 2>, scalar_prefetch = 0 : i64, scratch_operands = 1 : i64, tpu.core_type = #tpu.core_type<tc>, window_params = [{transform_indices = @transform_0, window_bounds = array<i64: 1, 128, 27>}, {pipeline_mode = #tpu.pipeline_mode<synchronous>, transform_indices = @transform_1, window_bounds = array<i64: 27, 128>}, {pipeline_mode = #tpu.pipeline_mode<synchronous>, transform_indices = @transform_2, window_bounds = array<i64: 1, 128>}, {pipeline_mode = #tpu.pipeline_mode<synchronous>, transform_indices = @transform_3, window_bounds = array<i64: 128, 512>}, {pipeline_mode = #tpu.pipeline_mode<synchronous>, transform_indices = @transform_4, window_bounds = array<i64: 1, 512>}, {pipeline_mode = #tpu.pipeline_mode<synchronous>, transform_indices = @transform_5, window_bounds = array<i64: 512, 128>}, {pipeline_mode = #tpu.pipeline_mode<synchronous>, transform_indices = @transform_6, window_bounds = array<i64: 1, 128>}, {transform_indices = @transform_7, window_bounds = array<i64: 1, 1, 128>}]} {
    %c0_i32 = arith.constant 0 : i32
    %0 = arith.cmpi eq, %arg1, %c0_i32 : i32
    %1 = arith.extui %0 : i1 to i32
    %c0_i32_0 = arith.constant 0 : i32
    %2 = arith.cmpi ne, %1, %c0_i32_0 : i32
    scf.if %2 {
      %cst_14 = arith.constant 0.000000e+00 : f32
      %20 = vector.broadcast %cst_14 : f32 to vector<1x128xf32>
      %c0_15 = arith.constant 0 : index
      %c0_16 = arith.constant 0 : index
      %21 = vector.load %arg10[%c0_15, %c0_16] : memref<1x128xf32, #tpu.memory_space<vmem>>, vector<1x128xf32>
      tpu.vector_store %arg10[%c0_15, %c0_16], %20 {strides = array<i32>} : memref<1x128xf32, #tpu.memory_space<vmem>>, vector<1x128xf32>,
    } else {
    }
    %c0 = arith.constant 0 : index
    %c0_1 = arith.constant 0 : index
    %c0_2 = arith.constant 0 : index
    %3 = vector.load %arg2[%c0, %c0_1, %c0_2] : memref<1x128x27xf32, #tpu.memory_space<vmem>>, vector<1x128x27xf32>
    %4 = vector.shape_cast %3 : vector<1x128x27xf32> to vector<128x27xf32>
    %c0_3 = arith.constant 0 : index
    %c0_4 = arith.constant 0 : index
    %5 = vector.load %arg3[%c0_3, %c0_4] : memref<27x128xf32, #tpu.memory_space<vmem>>, vector<27x128xf32>
    %cst = arith.constant dense<0.000000e+00> : vector<128x128xf32>
    %6 = tpu.matmul %4, %5, %cst {dimension_numbers = #tpu.dot_dimension_numbers<[1], [0], [0], [1], [0, 0, 1, 1], [], []>} : vector<128x27xf32>, vector<27x128xf32>, vector<128x128xf32> -> vector<128x128xf32>
    %c0_5 = arith.constant 0 : index
    %c0_6 = arith.constant 0 : index
    %7 = vector.load %arg4[%c0_5, %c0_6] : memref<1x128xf32, #tpu.memory_space<vmem>>, vector<1x128xf32>
    %8 = vector.broadcast %7 : vector<1x128xf32> to vector<128x128xf32>
    %9 = arith.addf %6, %8 : vector<128x128xf32>
    %cst_7 = arith.constant 0.000000e+00 : f32
    %10 = vector.broadcast %cst_7 : f32 to vector<128x128xf32>
    %11 = arith.maximumf %9, %10 : vector<128x128xf32>
    %c0_8 = arith.constant 0 : index
    %c0_9 = arith.constant 0 : index
    %12 = vector.load %arg10[%c0_8, %c0_9] : memref<1x128xf32, #tpu.memory_space<vmem>>, vector<1x128xf32>
    %cst_10 = arith.constant dense<0.000000e+00> : vector<128xf32>
    %13 = vector.multi_reduction <add>, %11, %cst_10 [0] : vector<128x128xf32> to vector<128xf32>
    %14 = vector.shape_cast %13 : vector<128xf32> to vector<1x128xf32>
    %15 = arith.addf %12, %14 : vector<1x128xf32>
    %c0_11 = arith.constant 0 : index
    %c0_12 = arith.constant 0 : index
    %16 = vector.load %arg10[%c0_11, %c0_12] : memref<1x128xf32, #tpu.memory_space<vmem>>, vector<1x128xf32>
    tpu.vector_store %arg10[%c0_11, %c0_12], %15 {strides = array<i32>} : memref<1x128xf32, #tpu.memory_space<vmem>>, vector<1x128xf32>,
    %c1_i32 = arith.constant 1 : i32
    %17 = arith.cmpi eq, %arg1, %c1_i32 : i32
    %18 = arith.extui %17 : i1 to i32
    %c0_i32_13 = arith.constant 0 : i32
    %19 = arith.cmpi ne, %18, %c0_i32_13 : i32
    scf.if %19 {
      %c0_14 = arith.constant 0 : index
      %c0_15 = arith.constant 0 : index
      %20 = vector.load %arg10[%c0_14, %c0_15] : memref<1x128xf32, #tpu.memory_space<vmem>>, vector<1x128xf32>
      %cst_16 = arith.constant 3.906250e-03 : f32
      %21 = vector.broadcast %cst_16 : f32 to vector<1x128xf32>
      %22 = arith.mulf %20, %21 : vector<1x128xf32>
      %c0_17 = arith.constant 0 : index
      %c0_18 = arith.constant 0 : index
      %23 = vector.load %arg5[%c0_17, %c0_18] : memref<128x512xf32, #tpu.memory_space<vmem>>, vector<128x512xf32>
      %cst_19 = arith.constant dense<0.000000e+00> : vector<1x512xf32>
      %24 = tpu.matmul %22, %23, %cst_19 {dimension_numbers = #tpu.dot_dimension_numbers<[1], [0], [0], [1], [0, 0, 1, 1], [], []>} : vector<1x128xf32>, vector<128x512xf32>, vector<1x512xf32> -> vector<1x512xf32>
      %c0_20 = arith.constant 0 : index
      %c0_21 = arith.constant 0 : index
      %25 = vector.load %arg6[%c0_20, %c0_21] : memref<1x512xf32, #tpu.memory_space<vmem>>, vector<1x512xf32>
      %26 = arith.addf %24, %25 : vector<1x512xf32>
      %27 = arith.mulf %26, %26 : vector<1x512xf32>
      %cst_22 = arith.constant dense<0.000000e+00> : vector<1xf32>
      %28 = vector.multi_reduction <add>, %27, %cst_22 [1] : vector<1x512xf32> to vector<1xf32>
      %29 = vector.shape_cast %28 : vector<1xf32> to vector<1x1xf32>
      %cst_23 = arith.constant 1.000000e-24 : f32
      %30 = vector.broadcast %cst_23 : f32 to vector<1x1xf32>
      %31 = arith.maximumf %29, %30 : vector<1x1xf32>
      %32 = math.rsqrt %31 : vector<1x1xf32>
      %33 = vector.broadcast %32 : vector<1x1xf32> to vector<1x512xf32>
      %34 = arith.mulf %26, %33 : vector<1x512xf32>
      %c0_24 = arith.constant 0 : index
      %c0_25 = arith.constant 0 : index
      %35 = vector.load %arg7[%c0_24, %c0_25] : memref<512x128xf32, #tpu.memory_space<vmem>>, vector<512x128xf32>
      %cst_26 = arith.constant dense<0.000000e+00> : vector<1x128xf32>
      %36 = tpu.matmul %34, %35, %cst_26 {dimension_numbers = #tpu.dot_dimension_numbers<[1], [0], [0], [1], [0, 0, 1, 1], [], []>} : vector<1x512xf32>, vector<512x128xf32>, vector<1x128xf32> -> vector<1x128xf32>
      %c0_27 = arith.constant 0 : index
      %c0_28 = arith.constant 0 : index
      %37 = vector.load %arg8[%c0_27, %c0_28] : memref<1x128xf32, #tpu.memory_space<vmem>>, vector<1x128xf32>
      %38 = arith.addf %36, %37 : vector<1x128xf32>
      %c0_29 = arith.constant 0 : index
      %c0_30 = arith.constant 0 : index
      %c0_31 = arith.constant 0 : index
      %39 = vector.load %arg9[%c0_29, %c0_30, %c0_31] : memref<1x1x128xf32, #tpu.memory_space<vmem>>, vector<1x1x128xf32>
      %40 = vector.shape_cast %39 : vector<1x1x128xf32> to vector<1x128xf32>
      %41 = vector.shape_cast %38 : vector<1x128xf32> to vector<1x1x128xf32>
      tpu.vector_store %arg9[%c0_29, %c0_30, %c0_31], %41 {strides = array<i32>} : memref<1x1x128xf32, #tpu.memory_space<vmem>>, vector<1x1x128xf32>,
    } else {
    }
    return
  }
  func.func @transform_0(%arg0: i32, %arg1: i32) -> (i32, i32, i32) {
    %c0_i32 = arith.constant 0 : i32
    %c0_i32_0 = arith.constant 0 : i32
    return %arg0, %arg1, %c0_i32 : i32, i32, i32
  }
  func.func @transform_1(%arg0: i32, %arg1: i32) -> (i32, i32) {
    %c0_i32 = arith.constant 0 : i32
    %c0_i32_0 = arith.constant 0 : i32
    %c0_i32_1 = arith.constant 0 : i32
    return %c0_i32, %c0_i32_0 : i32, i32
  }
  func.func @transform_2(%arg0: i32, %arg1: i32) -> (i32, i32) {
    %c0_i32 = arith.constant 0 : i32
    %c0_i32_0 = arith.constant 0 : i32
    %c0_i32_1 = arith.constant 0 : i32
    return %c0_i32, %c0_i32_0 : i32, i32
  }
  func.func @transform_3(%arg0: i32, %arg1: i32) -> (i32, i32) {
    %c0_i32 = arith.constant 0 : i32
    %c0_i32_0 = arith.constant 0 : i32
    %c0_i32_1 = arith.constant 0 : i32
    return %c0_i32, %c0_i32_0 : i32, i32
  }
  func.func @transform_4(%arg0: i32, %arg1: i32) -> (i32, i32) {
    %c0_i32 = arith.constant 0 : i32
    %c0_i32_0 = arith.constant 0 : i32
    %c0_i32_1 = arith.constant 0 : i32
    return %c0_i32, %c0_i32_0 : i32, i32
  }
  func.func @transform_5(%arg0: i32, %arg1: i32) -> (i32, i32) {
    %c0_i32 = arith.constant 0 : i32
    %c0_i32_0 = arith.constant 0 : i32
    %c0_i32_1 = arith.constant 0 : i32
    return %c0_i32, %c0_i32_0 : i32, i32
  }
  func.func @transform_6(%arg0: i32, %arg1: i32) -> (i32, i32) {
    %c0_i32 = arith.constant 0 : i32
    %c0_i32_0 = arith.constant 0 : i32
    %c0_i32_1 = arith.constant 0 : i32
    return %c0_i32, %c0_i32_0 : i32, i32
  }
  func.func @transform_7(%arg0: i32, %arg1: i32) -> (i32, i32, i32) {
    %c0_i32 = arith.constant 0 : i32
    %c0_i32_0 = arith.constant 0 : i32
    %c0_i32_1 = arith.constant 0 : i32
    return %arg0, %c0_i32, %c0_i32_0 : i32, i32, i32
  }
}

</mosaic_0001>

<bundles_post_ra>
// kernel: timm_model_forward.1
= control target key start
LH: loop header
LB: loop body
LE: loop exit
PB: predicated region body
PF: predicated region fallthrough
CT: control target
= control target key end

     0   :  { %12 = vsyncpa [#allocation4], 0  ;;  %s2226_s0 = inlined_call_operand.vmem [shape: f32[2,256,27], index: 0, kind: input, shape index: {}]   ;;  %s2227_s1 = inlined_call_operand.vmem [shape: f32[27,128], index: 1, kind: input, shape index: {}]   ;;  %s2228_s2 = inlined_call_operand.vmem [shape: f32[1,128], index: 2, kind: input, shape index: {}]   ;;  %s2229_s3 = inlined_call_operand.vmem [shape: f32[128,512], index: 3, kind: input, shape index: {}]   ;;  %s2230_s4 = inlined_call_operand.vmem [shape: f32[1,512], index: 4, kind: input, shape index: {}]   ;;  %s2231_s5 = inlined_call_operand.vmem [shape: f32[512,128], index: 5, kind: input, shape index: {}]   ;;  %s2232_s6 = inlined_call_operand.vmem [shape: f32[1,128], index: 6, kind: input, shape index: {}]   ;;  %s2233_s7 = inlined_call_operand.hbm [shape: f32[2,1,128], index: 7, kind: output, shape index: {}]  }
   0x1   :  { %14 = vsyncpa [#allocation4 + $0x1], 0  ;;  %s1630_s24 = smov 0   ;;  %s1632_s25 = smov 0  }
   0x2   :  { %s1634_s26 = smov 0   ;;  %s1636_s27 = smov 0  }
   0x3   :  { %s1638_s28 = smov 0   ;;  %s1640_s29 = smov 0  }
   0x4   :  { %s1642_s30 = smov 0   ;;  %s1644_s8 = smov 0  }
   0x5 LB: > { %s1119_s9 = sadd.s32 4294967295, %s1584_s8   ;;  %s1120_s10 = sadd.s32 4294967294, %s1584_s8   ;;  %s1584_s8 = sphi %s1644_s8, %s20_s8   ;;  %s1580_s30 = sphi %s1642_s30, %s2247_s30   ;;  %s1576_s29 = sphi %s1640_s29, %s2246_s29   ;;  %s1572_s28 = sphi %s1638_s28, %s2245_s28   ;;  %s1568_s27 = sphi %s1636_s27, %s2244_s27   ;;  %s1564_s26 = sphi %s1634_s26, %s2243_s26   ;;  %s1560_s25 = sphi %s1632_s25, %s2242_s25   ;;  %s1556_s24 = sphi %s1630_s24, %s2241_s24  }
   0x6   : > { %s29_s11 = sadd.s32 1, %s1576_s29  ;;  %s32_s12 = sadd.s32 1, %s1580_s30 }
   0x7   : > { %p30_p0 = scmp.ge.s32.totalorder %s29_s11, 2  ;;  %p203_p1 = scmp.ne.s32.totalorder %s1564_s26, %s1560_s25 }
   0x8   : > { %p204_p2 = scmp.eq.s32.totalorder %s1119_s9, 3  ;;  %p209_p4 = scmp.ne.s32.totalorder %s1560_s25, %s1556_s24 }
   0x9   : > { %s2249_s11 = smov (%p30_p0, %s29_s11), 0  ;;  %s2251_s12 = smov (!%p30_p0, %s32_s12), %s1580_s30 }
   0xa   : > { %2235 = sst [smem:[#allocation6_spill]] %s2249_s11  ;;  %p1679_p3 = por %p204_p2, %p203_p1 }
   0xb   : > { %p34_p5 = scmp.ge.s32.totalorder %s2251_s12, 2  ;;  %p210_p6 = scmp.eq.s32.totalorder %s1120_s10, 3 }
   0xc   : > { %p1123_p7 = scmp.ge.s32.totalorder %s1584_s8, 1  ;;  %p259_p8 = scmp.lt.s32.totalorder %s1584_s8, 5 }
   0xd   : > { %s2253_s12 = smov (%p34_p5, %s2251_s12), 0  ;;  %p1689_p9 = por %p210_p6, %p209_p4 }
   0xe   : > { %2237 = sst [smem:[#allocation7_spill]] %s2253_s12  ;;  %p260_p10 = pnand %p1123_p7, %p259_p8 }
   0xf   : > { %s190_s15 = ssub.s32 %s1580_s30, %s2253_s12  ;;  %s193_s16 = sadd.s32 1, %s1564_s26 }
  0x10   : > { %p191_p11 = scmp.eq.s32.totalorder %s190_s15, 0  ;;  %263 = sbr.rel (%p260_p10) target bundleno = 948 (0x3b4), region = 48 }
  0x11   : > { %s292_s18 = sand.u32 (!%p260_p10), 1, %s1560_s25   ;;  %s1124_s19 = sshll.u32 (!%p260_p10), %s1568_s27, 4 }
  0x12   : > { %s1697_s17 = scalar_select %p191_p11, %s1564_s26, %s193_s16  }
  0x13   : > { %p295_p12 = scmp.lt.s32.totalorder (!%p260_p10), %s1572_s28, 1  ;;  %p297_p13 = scmp.lt.s32.totalorder (!%p260_p10), %s1124_s19, 31 }
  0x14   : > { %s1710_s16 = scalar_lea.vmem (!%p260_p10), [#allocation3], %s292_s18  ;;  %p1127_p0 = scmp.ne.s32.totalorder (!%p260_p10), %s1568_s27, 0 }
  0x17   : > { %s296_s20 = scalar_select %p295_p12, %s1572_s28, 1 }
  0x18   : > { %s2255_s19 = smov (!%p297_p13, %s1124_s19), 31  ;;  %307 = sbr.rel (%p1127_p0) target bundleno = 31 (0x1f), region = 52 }
  0x19   : > { %s1125_s21 = sshll.u32 %s296_s20, 5  ;;  %v1586_v0 = vmov (!%p1127_p0), 0.0  }
  0x1a   : > { %s300_s22 = sadd.s32 %s1125_s21, %s2255_s19  ;;  %308 = vst [vmem:[#allocation2] sm:$0x1] (!%p1127_p0), %v1586_v0 }
  0x1b   : > { %s1126_s23 = sshll.u32 %s300_s22, 3 }
  0x1c   : > { %s1706_s15 = scalar_lea.vmem %s2226_s0, %s1126_s23 }
  0x1f PF: > { %v325_v1 = vld [vmem:[%s2227_s1] sm:$0xff]  ;;  %v326_v2 = vld [vmem:[%s2227_s1 + $0x8] sm:$0xff]  ;;  %v327_v3 = vld [vmem:[%s2227_s1 + $0x10] sm:$0xff]  ;;  %vm385_vm0 = vcmask 1042432   ;;  %vm336_vm1 = vcmask 220160   ;;  %vm1587_vm2 = vmmov 1  }
  0x20   : > { %v1272_v4 = vpack.c.bf16 %v326_v2, %v325_v1  ;;  %v328_v5 = vld [vmem:[%s2227_s1 + $0x18] sm:$0x7]  ;;  %v309_v6 = vld [vmem:[%s1706_s15] sm:$0xff]  ;;  %vm1277_vm3 = vmpackc.low %vm385_vm0, %vm1587_vm2  ;;  %p1146_p1 = scmp.ne.s32.totalorder %s1568_s27, 1 }
  0x21   : > { %v1276_v7 = vpack.c.bf16 %v328_v5, %v327_v3  ;;  %1248 = vmatprep.mubr.msk.f32.mxu0 %vm336_vm1, %v309_v6  ;;  %v317_v8 = vld [vmem:[%s1706_s15 + $0x40] sm:$0xff]  ;;  %v310_v9 = vld [vmem:[%s1706_s15 + $0x8] sm:$0xff]  ;;  %v311_v11 = vld [vmem:[%s1706_s15 + $0x10] sm:$0xff]  ;;  %vm812_vm4 = vcmask (!%p1146_p1), 1040384  }
  0x22   : > { %1273 = vmatprep.subr.bf16.mxu0 %v1272_v4  ;;  %1410 = vmatprep.subr.bf16.mxu1 %v1272_v4  ;;  %v318_v10 = vld [vmem:[%s1706_s15 + $0x48] sm:$0xff]  ;;  %v319_v12 = vld [vmem:[%s1706_s15 + $0x50] sm:$0xff]  ;;  %v312_v13 = vld [vmem:[%s1706_s15 + $0x18] sm:$0xff] }
  0x23   : > { %1275 = vmatpush3.bf16.msra.mxu0 %v1272_v4  ;;  %1412 = vmatpush3.bf16.msra.mxu1 %v1272_v4  ;;  %v320_v14 = vld [vmem:[%s1706_s15 + $0x58] sm:$0xff]  ;;  %v313_v15 = vld [vmem:[%s1706_s15 + $0x20] sm:$0xff]  ;;  %v314_v17 = vld [vmem:[%s1706_s15 + $0x28] sm:$0xff] }
  0x24   : > { %1278 = vmatprep.subr.msk.bf16.mxu0 %vm1277_vm3, %v1276_v7  ;;  %1411 = vmatprep.subr.msk.bf16.mxu1 %vm1277_vm3, %v1276_v7  ;;  %v321_v16 = vld [vmem:[%s1706_s15 + $0x60] sm:$0xff]  ;;  %v322_v18 = vld [vmem:[%s1706_s15 + $0x68] sm:$0xff]  ;;  %v315_v19 = vld [vmem:[%s1706_s15 + $0x30] sm:$0xff] }
  0x25   : > { %1260 = vmatprep.mubr.msk.f32.mxu1 %vm336_vm1, %v317_v8  ;;  %v323_v20 = vld [vmem:[%s1706_s15 + $0x70] sm:$0xff]  ;;  %v316_v21 = vld [vmem:[%s1706_s15 + $0x38] sm:$0xff]  ;;  %v1128_v23 = vld [vmem:[%s2228_s2] ss:$0 sm:$0xff] }
  0x26   : > { %v324_v22 = vld [vmem:[%s1706_s15 + $0x78] sm:$0xff] }
  0x27   : > { %1281 = vmatpush3.bf16.msk.msra.mxu0 %vm1277_vm3, %v1276_v7  ;;  %1413 = vmatpush3.bf16.msk.msra.mxu1 %vm1277_vm3, %v1276_v7 }
  0x2a   : > { %1249 = vmatmul.mubr.msk.f32.vlgmr.msra.gmra.mrb[0].mxu0 %vm336_vm1, %v310_v9  ;;  %1261 = vmatmul.mubr.msk.f32.vlgmr.msra.gmra.mrb[0].mxu1 %vm336_vm1, %v318_v10 }
  0x2b   : > { %1251 = vmatprep.mubr.msk.f32.mxu0 %vm336_vm1, %v311_v11  ;;  %1263 = vmatprep.mubr.msk.f32.mxu1 %vm336_vm1, %v319_v12 }
  0x2e   : > { %1252 = vmatmul.mubr.msk.f32.gmra.mrb[2].mxu0 %vm336_vm1, %v312_v13  ;;  %1264 = vmatmul.mubr.msk.f32.gmra.mrb[2].mxu1 %vm336_vm1, %v320_v14 }
  0x2f   : > { %1254 = vmatprep.mubr.msk.f32.mxu0 %vm336_vm1, %v313_v15  ;;  %1266 = vmatprep.mubr.msk.f32.mxu1 %vm336_vm1, %v321_v16 }
  0x32   : > { %1255 = vmatmul.mubr.msk.f32.gmra.mrb[4].mxu0 %vm336_vm1, %v314_v17  ;;  %1267 = vmatmul.mubr.msk.f32.gmra.mrb[4].mxu1 %vm336_vm1, %v322_v18 }
  0x33   : > { %1257 = vmatprep.mubr.msk.f32.mxu0 %vm336_vm1, %v315_v19  ;;  %1269 = vmatprep.mubr.msk.f32.mxu1 %vm336_vm1, %v323_v20 }
  0x36   : > { %1258 = vmatmul.mubr.msk.f32.gmra.mrb[6].mxu0 %vm336_vm1, %v316_v21  ;;  %1270 = vmatmul.mubr.msk.f32.gmra.mrb[6].mxu1 %vm336_vm1, %v324_v22 }
  0xfd   : > { %v1250_v24 = vpop.f32.mrb[0].mxu0  ;;  %v1262_v25 = vpop.f32.mrb[0].mxu1 }
  0xfe   : > { %v461_v26 = vadd.f32 %v1250_v24, %v1128_v23  ;;  %v455_v27 = vpop.f32.mrb[1].mxu0  ;;  %v495_v28 = vpop.f32.mrb[1].mxu1  ;;  %v501_v61 = vadd.f32 %v1262_v25, %v1128_v23 }
  0xff   : > { %v456_v29 = vadd.f32 %v1128_v23, %v455_v27  ;;  %v496_v53 = vadd.f32 %v1128_v23, %v495_v28 }
 0x100   : > { %v535_v30 = vmax.f32 %v461_v26, 0.0  ;;  %v543_v4 = vmax.f32 %v501_v61, 0.0  ;;  %v599_v61 = vld [vmem:[%s2229_s3 + $0x98] sm:$0xff] (!%p1146_p1) }
 0x101   : > { %v534_v31 = vmax.f32 %v456_v29, 0.0  ;;  %v1253_v32 = vpop.f32.mrb[2].mxu0  ;;  %v1265_v33 = vpop.f32.mrb[2].mxu1  ;;  %v542_v0 = vmax.f32 %v496_v53, 0.0  ;;  %v550_v29 = vld [vmem:[#allocation2] sm:$0x1] }
 0x102   : > { %v465_v34 = vpop.f32.mrb[3].mxu0  ;;  %v505_v35 = vpop.f32.mrb[3].mxu1  ;;  %v471_v37 = vadd.f32 %v1253_v32, %v1128_v23  ;;  %v511_v3 = vadd.f32 %v1265_v33, %v1128_v23  ;;  %v585_v32 = vld [vmem:[%s2229_s3 + $0x28] sm:$0xff] (!%p1146_p1)  ;;  %v580_v33 = vld [vmem:[%s2229_s3] sm:$0xff] (!%p1146_p1) }
 0x103   : > { %v551_v36 = vadd.f32 %v535_v30, %v534_v31  ;;  %v466_v38 = vadd.f32 %v1128_v23, %v465_v34  ;;  %v506_v1 = vadd.f32 %v1128_v23, %v505_v35  ;;  %v584_v35 = vld [vmem:[%s2229_s3 + $0x20] sm:$0xff] (!%p1146_p1) }
 0x104   : > { %v537_v44 = vmax.f32 %v471_v37, 0.0  ;;  %v545_v9 = vmax.f32 %v511_v3, 0.0  ;;  %v587_v37 = vld [vmem:[%s2229_s3 + $0x38] sm:$0xff] (!%p1146_p1)  ;;  %v605_v3 = vld [vmem:[%s2229_s3 + $0xc8] sm:$0xff] (!%p1146_p1) }
 0x105   : > { %v536_v39 = vmax.f32 %v466_v38, 0.0  ;;  %v1256_v40 = vpop.f32.mrb[4].mxu0  ;;  %v1268_v41 = vpop.f32.mrb[4].mxu1  ;;  %v544_v6 = vmax.f32 %v506_v1, 0.0  ;;  %v1588_v38 = vmov (!%p1146_p1), 0.0  }
 0x106   : > { %v475_v42 = vpop.f32.mrb[5].mxu0  ;;  %v515_v43 = vpop.f32.mrb[5].mxu1  ;;  %v481_v46 = vadd.f32 %v1256_v40, %v1128_v23  ;;  %v521_v11 = vadd.f32 %v1268_v41, %v1128_v23  ;;  %730 = vmatprep.mubr.f32.mxu0 (!%p1146_p1), %v1588_v38  ;;  %801 = vmatprep.mubr.f32.mxu1 (!%p1146_p1), %v1588_v38  ;;  %v582_v41 = vld [vmem:[%s2229_s3 + $0x10] sm:$0xff] (!%p1146_p1)  ;;  %v629_v38 = vld [vmem:[%s2229_s3 + $0x188] sm:$0xff] (!%p1146_p1) }
 0x107   : > { %v552_v45 = vadd.f32 %v551_v36, %v536_v39  ;;  %v476_v47 = vadd.f32 %v1128_v23, %v475_v42  ;;  %v516_v7 = vadd.f32 %v1128_v23, %v515_v43  ;;  %v583_v36 = vld [vmem:[%s2229_s3 + $0x18] sm:$0xff] (!%p1146_p1)  ;;  %v1284_v39 = vpack.c.bf16 (!%p1146_p1), %v584_v35, %v580_v33  ;;  %v586_v42 = vld [vmem:[%s2229_s3 + $0x30] sm:$0xff] (!%p1146_p1)  ;;  %v589_v43 = vld [vmem:[%s2229_s3 + $0x48] sm:$0xff] (!%p1146_p1) }
 0x108   : > { %v539_v55 = vmax.f32 %v481_v46, 0.0  ;;  %v547_v15 = vmax.f32 %v521_v11, 0.0  ;;  %v1314_v40 = vpack.c.bf16 (!%p1146_p1), %v587_v37, %v583_v36  ;;  %v588_v46 = vld [vmem:[%s2229_s3 + $0x40] sm:$0xff] (!%p1146_p1)  ;;  %v622_v35 = vld [vmem:[%s2229_s3 + $0x150] sm:$0xff] (!%p1146_p1) }
 0x109   : > { %v538_v48 = vmax.f32 %v476_v47, 0.0  ;;  %v553_v49 = vadd.f32 %v552_v45, %v537_v44  ;;  %v1259_v50 = vpop.f32.mrb[6].mxu0  ;;  %v1271_v51 = vpop.f32.mrb[6].mxu1  ;;  %v546_v12 = vmax.f32 %v516_v7, 0.0  ;;  %v1316_v44 = vpack.c.bf16 (!%p1146_p1), %v586_v42, %v582_v41  ;;  %v593_v45 = vld [vmem:[%s2229_s3 + $0x68] sm:$0xff] (!%p1146_p1)  ;;  %v592_v47 = vld [vmem:[%s2229_s3 + $0x60] sm:$0xff] (!%p1146_p1) }
 0x10a   : > { %v485_v52 = vpop.f32.mrb[7].mxu0  ;;  %v525_v54 = vpop.f32.mrb[7].mxu1  ;;  %v491_v57 = vadd.f32 %v1259_v50, %v1128_v23  ;;  %v531_v17 = vadd.f32 %v1271_v51, %v1128_v23  ;;  %1315 = vmatprep.subr.bf16.mxu1 (!%p1146_p1), %v1314_v40  ;;  %v591_v50 = vld [vmem:[%s2229_s3 + $0x58] sm:$0xff] (!%p1146_p1)  ;;  %v620_v33 = vld [vmem:[%s2229_s3 + $0x140] sm:$0xff] (!%p1146_p1)  ;;  %v626_v37 = vld [vmem:[%s2229_s3 + $0x170] sm:$0xff] (!%p1146_p1) }
 0x10b   : > { %v554_v56 = vadd.f32 %v553_v49, %v538_v48  ;;  %v486_v58 = vadd.f32 %v1128_v23, %v485_v52  ;;  %v526_v13 = vadd.f32 %v1128_v23, %v525_v54  ;;  %v581_v23 = vld [vmem:[%s2229_s3 + $0x8] sm:$0xff] (!%p1146_p1)  ;;  %v1286_v48 = vpack.c.bf16 (!%p1146_p1), %v593_v45, %v589_v43  ;;  %v595_v51 = vld [vmem:[%s2229_s3 + $0x78] sm:$0xff] (!%p1146_p1)  ;;  %v590_v52 = vld [vmem:[%s2229_s3 + $0x50] sm:$0xff] (!%p1146_p1)  ;;  %1317 = vmatpush1.bf16.msra.mxu1 (!%p1146_p1), %v1316_v44 }
 0x10c   : > { %v541_v62 = vmax.f32 %v491_v57, 0.0  ;;  %v549_v20 = vmax.f32 %v531_v17, 0.0  ;;  %v1282_v34 = vpack.c.bf16 (!%p1146_p1), %v585_v32, %v581_v23  ;;  %v1288_v49 = vpack.c.bf16 (!%p1146_p1), %v592_v47, %v588_v46  ;;  %v594_v54 = vld [vmem:[%s2229_s3 + $0x70] sm:$0xff] (!%p1146_p1)  ;;  %v615_v17 = vld [vmem:[%s2229_s3 + $0x118] sm:$0xff] (!%p1146_p1)  ;;  %v628_v45 = vld [vmem:[%s2229_s3 + $0x180] sm:$0xff] (!%p1146_p1) }
 0x10d   : > { %v540_v59 = vmax.f32 %v486_v58, 0.0  ;;  %v555_v60 = vadd.f32 %v554_v56, %v539_v55  ;;  %v548_v18 = vmax.f32 %v526_v13, 0.0  ;;  %v1318_v53 = vpack.c.bf16 (!%p1146_p1), %v595_v51, %v591_v50  ;;  %v597_v55 = vld [vmem:[%s2229_s3 + $0x88] sm:$0xff] (!%p1146_p1)  ;;  %v610_v13 = vld [vmem:[%s2229_s3 + $0xf0] sm:$0xff] (!%p1146_p1)  ;;  %v631_v40 = vld [vmem:[%s2229_s3 + $0x198] sm:$0xff] (!%p1146_p1) }
 0x10e   : > { %1283 = vmatprep.subr.bf16.mxu0 (!%p1146_p1), %v1282_v34  ;;  %v601_v56 = vld [vmem:[%s2229_s3 + $0xa8] sm:$0xff] (!%p1146_p1)  ;;  %v1320_v57 = vpack.c.bf16 (!%p1146_p1), %v594_v54, %v590_v52  ;;  %v624_v34 = vld [vmem:[%s2229_s3 + $0x160] sm:$0xff] (!%p1146_p1)  ;;  %v635_v41 = vld [vmem:[%s2229_s3 + $0x1b8] sm:$0xff] (!%p1146_p1)  ;;  %v1336_v43 = vpack.c.bf16 (!%p1146_p1), %v626_v37, %v622_v35 }
 0x10f   : > { %v556_v63 = vadd.f32 %v555_v60, %v540_v59  ;;  %1285 = vmatpush1.bf16.msra.mxu0 (!%p1146_p1), %v1284_v39  ;;  %v1290_v58 = vpack.c.bf16 (!%p1146_p1), %v601_v56, %v597_v55  ;;  %v596_v59 = vld [vmem:[%s2229_s3 + $0x80] sm:$0xff] (!%p1146_p1)  ;;  %1319 = vmatprep.subr.bf16.mxu1 (!%p1146_p1), %v1318_v53  ;;  %v633_v39 = vld [vmem:[%s2229_s3 + $0x1a8] sm:$0xff] (!%p1146_p1)  ;;  %v1304_v42 = vpack.c.bf16 (!%p1146_p1), %v624_v34, %v620_v33  ;;  %v630_v47 = vld [vmem:[%s2229_s3 + $0x190] sm:$0xff] (!%p1146_p1) }
 0x110   : > { %1287 = vmatprep.subr.bf16.mxu0 (!%p1146_p1), %v1286_v48  ;;  %v600_v60 = vld [vmem:[%s2229_s3 + $0xa0] sm:$0xff] (!%p1146_p1)  ;;  %1321 = vmatpush1.bf16.msra.mxu1 (!%p1146_p1), %v1320_v57  ;;  %v1306_v44 = vpack.c.bf16 (!%p1146_p1), %v633_v39, %v629_v38  ;;  %v1338_v48 = vpack.c.bf16 (!%p1146_p1), %v635_v41, %v631_v40  ;;  %v637_v50 = vld [vmem:[%s2229_s3 + $0x1c8] sm:$0xff] (!%p1146_p1)  ;;  %v639_v52 = vld [vmem:[%s2229_s3 + $0x1d8] sm:$0xff] (!%p1146_p1) }
 0x111   : > { %v557_v2 = vadd.f32 %v556_v63, %v541_v62  ;;  %v603_v62 = vld [vmem:[%s2229_s3 + $0xb8] sm:$0xff] (!%p1146_p1)  ;;  %v598_v63 = vld [vmem:[%s2229_s3 + $0x90] sm:$0xff] (!%p1146_p1)  ;;  %v1292_v1 = vpack.c.bf16 (!%p1146_p1), %v600_v60, %v596_v59  ;;  %v632_v46 = vld [vmem:[%s2229_s3 + $0x1a0] sm:$0xff] (!%p1146_p1) }
 0x112   : > { %v641_v51 = vld [vmem:[%s2229_s3 + $0x1e8] sm:$0xff] (!%p1146_p1)  ;;  %v643_v53 = vld [vmem:[%s2229_s3 + $0x1f8] sm:$0xff] (!%p1146_p1)  ;;  %v1308_v54 = vpack.c.bf16 (!%p1146_p1), %v632_v46, %v628_v45  ;;  %v636_v57 = vld [vmem:[%s2229_s3 + $0x1c0] sm:$0xff] (!%p1146_p1) }
 0x113   : > { %v558_v5 = vadd.f32 %v557_v2, %v542_v0  ;;  %v602_v0 = vld [vmem:[%s2229_s3 + $0xb0] sm:$0xff] (!%p1146_p1)  ;;  %1289 = vmatpush1.bf16.msra.mxu0 (!%p1146_p1), %v1288_v49  ;;  %v1322_v2 = vpack.c.bf16 (!%p1146_p1), %v603_v62, %v599_v61  ;;  %v1310_v56 = vpack.c.bf16 (!%p1146_p1), %v641_v51, %v637_v50  ;;  %v1342_v59 = vpack.c.bf16 (!%p1146_p1), %v643_v53, %v639_v52  ;;  %v833_v33 = vld [vmem:[%s2231_s5 + $0x28] sm:$0xff] (!%p1146_p1)  ;;  %v864_v34 = vld [vmem:[%s2231_s5 + $0x120] sm:$0xff] (!%p1146_p1) }
 0x114   : > { %1291 = vmatprep.subr.bf16.mxu0 (!%p1146_p1), %v1290_v58  ;;  %v634_v49 = vld [vmem:[%s2229_s3 + $0x1b0] sm:$0xff] (!%p1146_p1)  ;;  %v640_v58 = vld [vmem:[%s2229_s3 + $0x1e0] sm:$0xff] (!%p1146_p1)  ;;  %v865_v35 = vld [vmem:[%s2231_s5 + $0x128] sm:$0xff] (!%p1146_p1)  ;;  %v646_v50 = vlaneseq (!%p1146_p1) }
 0x115   : > { %v559_v8 = vadd.f32 %v558_v5, %v543_v4  ;;  %v609_v4 = vld [vmem:[%s2229_s3 + $0xe8] sm:$0xff] (!%p1146_p1)  ;;  %v604_v5 = vld [vmem:[%s2229_s3 + $0xc0] sm:$0xff] (!%p1146_p1)  ;;  %1323 = vmatprep.subr.bf16.mxu1 (!%p1146_p1), %v1322_v2  ;;  %v1340_v55 = vpack.c.bf16 (!%p1146_p1), %v634_v49, %v630_v47  ;;  %v638_v60 = vld [vmem:[%s2229_s3 + $0x1d0] sm:$0xff] (!%p1146_p1)  ;;  %v1312_v62 = vpack.c.bf16 (!%p1146_p1), %v640_v58, %v636_v57  ;;  %v1388_v40 = vpack.c.bf16 (!%p1146_p1), %v865_v35, %v864_v34 }
 0x116   : > { %v1294_v7 = vpack.c.bf16 (!%p1146_p1), %v609_v4, %v605_v3  ;;  %v642_v61 = vld [vmem:[%s2229_s3 + $0x1f0] sm:$0xff] (!%p1146_p1)  ;;  %v844_v2 = vld [vmem:[%s2231_s5 + $0x80] sm:$0xff] (!%p1146_p1)  ;;  %v845_v3 = vld [vmem:[%s2231_s5 + $0x88] sm:$0xff] (!%p1146_p1)  ;;  %v647_v51 = vshrl.u32 (!%p1146_p1), %v646_v50, 7 }
 0x117   : > { %v560_v10 = vadd.f32 %v559_v8, %v544_v6  ;;  %v1324_v6 = vpack.c.bf16 (!%p1146_p1), %v602_v0, %v598_v63  ;;  %v608_v8 = vld [vmem:[%s2229_s3 + $0xe0] sm:$0xff] (!%p1146_p1)  ;;  %1293 = vmatpush1.bf16.msra.mxu0 (!%p1146_p1), %v1292_v1  ;;  %v1344_v0 = vpack.c.bf16 (!%p1146_p1), %v642_v61, %v638_v60  ;;  %v850_v37 = vld [vmem:[%s2231_s5 + $0xb0] sm:$0xff] (!%p1146_p1)  ;;  %v851_v38 = vld [vmem:[%s2231_s5 + $0xb8] sm:$0xff] (!%p1146_p1) }
 0x118   : > { %1295 = vmatprep.subr.bf16.mxu0 (!%p1146_p1), %v1294_v7  ;;  %v876_v4 = vld [vmem:[%s2231_s5 + $0x180] sm:$0xff] (!%p1146_p1)  ;;  %v882_v39 = vld [vmem:[%s2231_s5 + $0x1b0] sm:$0xff] (!%p1146_p1)  ;;  %v1358_v41 = vpack.c.bf16 (!%p1146_p1), %v851_v38, %v850_v37  ;;  %v867_v47 = vld [vmem:[%s2231_s5 + $0x138] sm:$0xff] (!%p1146_p1)  ;;  %v648_v52 = vsub.s32 (!%p1146_p1), 0, %v647_v51 }
 0x119   : > { %v561_v14 = vadd.f32 %v560_v10, %v545_v9  ;;  %v607_v9 = vld [vmem:[%s2229_s3 + $0xd8] sm:$0xff] (!%p1146_p1)  ;;  %1325 = vmatpush1.bf16.msra.mxu1 (!%p1146_p1), %v1324_v6  ;;  %v877_v6 = vld [vmem:[%s2231_s5 + $0x188] sm:$0xff] (!%p1146_p1)  ;;  %v828_v7 = vld [vmem:[%s2231_s5] sm:$0xff] (!%p1146_p1) }
 0x11a   : > { %v611_v10 = vld [vmem:[%s2229_s3 + $0xf8] sm:$0xff] (!%p1146_p1)  ;;  %v866_v46 = vld [vmem:[%s2231_s5 + $0x130] sm:$0xff] (!%p1146_p1)  ;;  %v644_v53 = vld [vmem:[%s2230_s4] sm:$0xf] (!%p1146_p1) }
 0x11b   : > { %v562_v16 = vadd.f32 %v561_v14, %v546_v12  ;;  %v1326_v11 = vpack.c.bf16 (!%p1146_p1), %v611_v10, %v607_v9  ;;  %v606_v12 = vld [vmem:[%s2229_s3 + $0xd0] sm:$0xff] (!%p1146_p1)  ;;  %v613_v14 = vld [vmem:[%s2229_s3 + $0x108] sm:$0xff] (!%p1146_p1)  ;;  %v1378_v9 = vpack.c.bf16 (!%p1146_p1), %v877_v6, %v876_v4  ;;  %v1392_v49 = vpack.c.bf16 (!%p1146_p1), %v867_v47, %v866_v46  ;;  %v839_v34 = vld [vmem:[%s2231_s5 + $0x58] sm:$0xff] (!%p1146_p1) }
 0x11c   : > { %v649_v57 = vrot.slane (!%p1146_p1), %v644_v53, %v648_v52  ;;  %v870_v37 = vld [vmem:[%s2231_s5 + $0x150] sm:$0xff] (!%p1146_p1)  ;;  %v871_v38 = vld [vmem:[%s2231_s5 + $0x158] sm:$0xff] (!%p1146_p1)  ;;  %v840_v46 = vld [vmem:[%s2231_s5 + $0x60] sm:$0xff] (!%p1146_p1) }
 0x11d   : > { %v563_v19 = vadd.f32 %v562_v16, %v547_v15  ;;  %v617_v15 = vld [vmem:[%s2229_s3 + $0x128] sm:$0xff] (!%p1146_p1)  ;;  %v1296_v16 = vpack.c.bf16 (!%p1146_p1), %v608_v8, %v604_v5  ;;  %1327 = vmatprep.subr.bf16.mxu1 (!%p1146_p1), %v1326_v11  ;;  %v1346_v5 = vpack.c.bf16 (!%p1146_p1), %v845_v3, %v844_v2  ;;  %v860_v11 = vld [vmem:[%s2231_s5 + $0x100] sm:$0xff] (!%p1146_p1)  ;;  %v859_v52 = vld [vmem:[%s2231_s5 + $0xf8] sm:$0xff] (!%p1146_p1) }
 0x11e   : > { %v829_v8 = vld [vmem:[%s2231_s5 + $0x8] sm:$0xff] (!%p1146_p1) }
 0x11f   : > { %v564_v21 = vadd.f32 %v563_v19, %v548_v18  ;;  %v619_v18 = vld [vmem:[%s2229_s3 + $0x138] sm:$0xff] (!%p1146_p1)  ;;  %v1328_v19 = vpack.c.bf16 (!%p1146_p1), %v610_v13, %v606_v12  ;;  %1297 = vmatpush1.bf16.msra.mxu0 (!%p1146_p1), %v1296_v16  ;;  %v1348_v10 = vpack.c.bf16 (!%p1146_p1), %v829_v8, %v828_v7  ;;  %v861_v12 = vld [vmem:[%s2231_s5 + $0x108] sm:$0xff] (!%p1146_p1)  ;;  %v846_v13 = vld [vmem:[%s2231_s5 + $0x90] sm:$0xff] (!%p1146_p1) }
 0x120   : > { %v878_v16 = vld [vmem:[%s2231_s5 + $0x190] sm:$0xff] (!%p1146_p1)  ;;  %v841_v47 = vld [vmem:[%s2231_s5 + $0x68] sm:$0xff] (!%p1146_p1) }
 0x121   : > { %v565_v22 = vadd.f32 %v564_v21, %v549_v20  ;;  %v1298_v20 = vpack.c.bf16 (!%p1146_p1), %v617_v15, %v613_v14  ;;  %v612_v21 = vld [vmem:[%s2229_s3 + $0x100] sm:$0xff] (!%p1146_p1)  ;;  %1329 = vmatpush1.bf16.msra.mxu1 (!%p1146_p1), %v1328_v19  ;;  %v1380_v14 = vpack.c.bf16 (!%p1146_p1), %v861_v12, %v860_v11  ;;  %v847_v15 = vld [vmem:[%s2231_s5 + $0x98] sm:$0xff] (!%p1146_p1)  ;;  %v873_v50 = vld [vmem:[%s2231_s5 + $0x168] sm:$0xff] (!%p1146_p1) }
 0x123   : > { %v566_v24 = vrot.slane %v565_v22, 4  ;;  %1299 = vmatprep.subr.bf16.mxu0 (!%p1146_p1), %v1298_v20  ;;  %v830_v20 = vld [vmem:[%s2231_s5 + $0x10] sm:$0xff] (!%p1146_p1) }
 0x125   : > { %v567_v25 = vadd.f32 %v566_v24, %v565_v22  ;;  %v616_v22 = vld [vmem:[%s2229_s3 + $0x120] sm:$0xff] (!%p1146_p1)  ;;  %v614_v24 = vld [vmem:[%s2229_s3 + $0x110] sm:$0xff] (!%p1146_p1) }
 0x127   : > { %v568_v26 = vrot.slane %v567_v25, 2 }
 0x129   : > { %v569_v27 = vadd.f32 %v568_v26, %v567_v25  ;;  %v1330_v25 = vpack.c.bf16 (!%p1146_p1), %v619_v18, %v615_v17  ;;  %v618_v26 = vld [vmem:[%s2229_s3 + $0x130] sm:$0xff] (!%p1146_p1)  ;;  %v879_v17 = vld [vmem:[%s2231_s5 + $0x198] sm:$0xff] (!%p1146_p1)  ;;  %v1350_v18 = vpack.c.bf16 (!%p1146_p1), %v847_v15, %v846_v13 }
 0x12a   : > { %v1332_v23 = vpack.c.bf16 (!%p1146_p1), %v618_v26, %v614_v24  ;;  %v1382_v19 = vpack.c.bf16 (!%p1146_p1), %v879_v17, %v878_v16  ;;  %v848_v26 = vld [vmem:[%s2231_s5 + $0xa0] sm:$0xff] (!%p1146_p1)  ;;  %v853_v17 = vld [vmem:[%s2231_s5 + $0xc8] sm:$0xff] (!%p1146_p1) }
 0x12b   : > { %v570_v28 = vrot.slane %v569_v27, 1  ;;  %577 = sbr.rel (%p1146_p1) target bundleno = 924 (0x39c), region = 56  ;;  %1331 = vmatprep.subr.bf16.mxu1 (!%p1146_p1), %v1330_v25  ;;  %v863_v25 = vld [vmem:[%s2231_s5 + $0x118] sm:$0xff] (!%p1146_p1)  ;;  %v852_v16 = vld [vmem:[%s2231_s5 + $0xc0] sm:$0xff] (!%p1146_p1) }
 0x12c   : > { %1333 = vmatpush1.bf16.msra.mxu1 (!%p1146_p1), %v1332_v23  ;;  %v832_v23 = vld [vmem:[%s2231_s5 + $0x20] sm:$0xff] (!%p1146_p1) }
 0x12d   : > { %v571_v30 = vadd.f32 %v570_v28, %v569_v27  ;;  %v621_v27 = vld [vmem:[%s2229_s3 + $0x148] sm:$0xff] (!%p1146_p1) }
 0x12e   : > { %v625_v28 = vld [vmem:[%s2229_s3 + $0x168] sm:$0xff] (!%p1146_p1) }
 0x12f   : > { %v572_v31 = vadd.f32 %v571_v30, %v550_v29  ;;  %v623_v29 = vld [vmem:[%s2229_s3 + $0x158] sm:$0xff] (!%p1146_p1)  ;;  %v1302_v32 = vpack.c.bf16 (!%p1146_p1), %v625_v28, %v621_v27  ;;  %v849_v27 = vld [vmem:[%s2231_s5 + $0xa8] sm:$0xff] (!%p1146_p1) }
 0x130   : > { %v627_v30 = vld [vmem:[%s2229_s3 + $0x178] sm:$0xff] (!%p1146_p1) }
 0x131   : > { %573 = vst [vmem:[#allocation2] sm:$0x1] %v572_v31  ;;  %v1300_v31 = vpack.c.bf16 (!%p1146_p1), %v616_v22, %v612_v21  ;;  %v1334_v36 = vpack.c.bf16 (!%p1146_p1), %v627_v30, %v623_v29  ;;  %v831_v21 = vld [vmem:[%s2231_s5 + $0x18] sm:$0xff] (!%p1146_p1)  ;;  %v862_v22 = vld [vmem:[%s2231_s5 + $0x110] sm:$0xff] (!%p1146_p1)  ;;  %v1354_v29 = vpack.c.bf16 (!%p1146_p1), %v849_v27, %v848_v26  ;;  %v880_v30 = vld [vmem:[%s2231_s5 + $0x1a0] sm:$0xff] (!%p1146_p1) }
 0x132   : > { %v1352_v24 = vpack.c.bf16 %v831_v21, %v830_v20  ;;  %v1384_v28 = vpack.c.bf16 %v863_v25, %v862_v22  ;;  %v885_v20 = vld [vmem:[%s2231_s5 + $0x1c8] sm:$0xff]  ;;  %v836_v21 = vld [vmem:[%s2231_s5 + $0x40] sm:$0xff] }
 0x133   : > { %1301 = vmatpush1.bf16.msra.mxu0 %v1300_v31  ;;  %1335 = vmatprep.subr.bf16.mxu1 %v1334_v36  ;;  %v881_v31 = vld [vmem:[%s2231_s5 + $0x1a8] sm:$0xff]  ;;  %v1356_v36 = vpack.c.bf16 %v833_v33, %v832_v23  ;;  %v868_v26 = vld [vmem:[%s2231_s5 + $0x140] sm:$0xff]  ;;  %v838_v33 = vld [vmem:[%s2231_s5 + $0x50] sm:$0xff] }
 0x134   : > { %1303 = vmatprep.subr.bf16.mxu0 %v1302_v32  ;;  %1337 = vmatpush1.bf16.msra.mxu1 %v1336_v43  ;;  %v1386_v32 = vpack.c.bf16 %v881_v31, %v880_v30  ;;  %v834_v43 = vld [vmem:[%s2231_s5 + $0x30] sm:$0xff]  ;;  %v837_v22 = vld [vmem:[%s2231_s5 + $0x48] sm:$0xff]  ;;  %v855_v30 = vld [vmem:[%s2231_s5 + $0xd8] sm:$0xff] }
 0x135   : > { %1339 = vmatprep.subr.bf16.mxu1 %v1338_v48  ;;  %v1364_v25 = vpack.c.bf16 %v837_v22, %v836_v21  ;;  %v869_v27 = vld [vmem:[%s2231_s5 + $0x148] sm:$0xff]  ;;  %v886_v31 = vld [vmem:[%s2231_s5 + $0x1d0] sm:$0xff] }
 0x137   : > { %1305 = vmatpush1.bf16.msra.mxu0 %v1304_v42  ;;  %v883_v42 = vld [vmem:[%s2231_s5 + $0x1b8] sm:$0xff] }
 0x138   : > { %1307 = vmatprep.subr.bf16.mxu0 %v1306_v44  ;;  %v578_v63 = vld [vmem:[#allocation2] sm:$0x1]  ;;  %1341 = vmatpush1.bf16.msra.mxu1 %v1340_v55  ;;  %v835_v44 = vld [vmem:[%s2231_s5 + $0x38] sm:$0xff]  ;;  %v1390_v45 = vpack.c.bf16 %v883_v42, %v882_v39  ;;  %v656_v55 = vsub.s32 2, %v647_v51 }
 0x139   : > { %1343 = vmatprep.subr.bf16.mxu1 %v1342_v59  ;;  %v579_v1 = vmul.f32 0.00390625, %v578_v63  ;;  %v1360_v48 = vpack.c.bf16 %v835_v44, %v834_v43  ;;  %v856_v39 = vld [vmem:[%s2231_s5 + $0xe0] sm:$0xff]  ;;  %v889_v43 = vld [vmem:[%s2231_s5 + $0x1e8] sm:$0xff] }
 0x13a   : > { %v657_v59 = vrot.slane %v644_v53, %v656_v55  ;;  %v888_v42 = vld [vmem:[%s2231_s5 + $0x1e0] sm:$0xff]  ;;  %v890_v55 = vld [vmem:[%s2231_s5 + $0x1f0] sm:$0xff] }
 0x13b   : > { %1309 = vmatpush1.bf16.msra.mxu0 %v1308_v54  ;;  %v652_v54 = vsub.s32 1, %v647_v51 }
 0x13c   : > { %1311 = vmatprep.subr.bf16.mxu0 %v1310_v56  ;;  %1345 = vmatpush1.bf16.msra.mxu1 %v1344_v0  ;;  %v660_v56 = vsub.s32 3, %v647_v51  ;;  %v858_v51 = vld [vmem:[%s2231_s5 + $0xf0] sm:$0xff] }
 0x13d   : > { %1379 = vmatprep.subr.bf16.mxu1 %v1378_v9  ;;  %v653_v58 = vrot.slane %v644_v53, %v652_v54  ;;  %v1374_v54 = vpack.c.bf16 %v859_v52, %v858_v51 }
 0x13e   : > { %v661_v60 = vrot.slane %v644_v53, %v660_v56  ;;  %v891_v56 = vld [vmem:[%s2231_s5 + $0x1f8] sm:$0xff] }
 0x13f   : > { %1313 = vmatpush1.bf16.msra.mxu0 %v1312_v62  ;;  %802 = vmatmul.mubr.f32.vlgmr.msra.gmra.mrb[0].mxu1 %v579_v1 }
 0x140   : > { %1347 = vmatprep.subr.bf16.mxu0 %v1346_v5  ;;  %1381 = vmatpush3.bf16.msra.mxu1 %v1380_v14 }
 0x141   : > { %1383 = vmatprep.subr.bf16.mxu1 %v1382_v19  ;;  %v1362_v19 = vpack.c.bf16 %v853_v17, %v852_v16 }
 0x142   : > { %731 = vmatmul.mubr.f32.vlgmr.msra.gmra.mrb[0].mxu0 %v579_v1 }
 0x143   : > { %1349 = vmatpush3.bf16.msra.mxu0 %v1348_v10 }
 0x144   : > { %1351 = vmatprep.subr.bf16.mxu0 %v1350_v18  ;;  %1385 = vmatpush3.bf16.msra.mxu1 %v1384_v28  ;;  %v884_v18 = vld [vmem:[%s2231_s5 + $0x1c0] sm:$0xff]  ;;  %v1396_v28 = vpack.c.bf16 %v869_v27, %v868_v26 }
 0x145   : > { %1387 = vmatprep.subr.bf16.mxu1 %v1386_v32  ;;  %v887_v32 = vld [vmem:[%s2231_s5 + $0x1d8] sm:$0xff] }
 0x146   : > { %v1398_v35 = vpack.c.bf16 %v887_v32, %v886_v31 }
 0x147   : > { %1353 = vmatpush3.bf16.msra.mxu0 %v1352_v24  ;;  %v1394_v24 = vpack.c.bf16 %v885_v20, %v884_v18 }
 0x148   : > { %1355 = vmatprep.subr.bf16.mxu0 %v1354_v29  ;;  %1389 = vmatpush3.bf16.msra.mxu1 %v1388_v40  ;;  %v854_v29 = vld [vmem:[%s2231_s5 + $0xd0] sm:$0xff]  ;;  %v1400_v40 = vpack.c.bf16 %v871_v38, %v870_v37 }
 0x149   : > { %1391 = vmatprep.subr.bf16.mxu1 %v1390_v45  ;;  %v1366_v23 = vpack.c.bf16 %v855_v30, %v854_v29  ;;  %v1402_v45 = vpack.c.bf16 %v889_v43, %v888_v42 }
 0x14b   : > { %1357 = vmatpush3.bf16.msra.mxu0 %v1356_v36  ;;  %v1368_v36 = vpack.c.bf16 %v839_v34, %v838_v33 }
 0x14c   : > { %1359 = vmatprep.subr.bf16.mxu0 %v1358_v41  ;;  %1393 = vmatpush3.bf16.msra.mxu1 %v1392_v49  ;;  %v857_v41 = vld [vmem:[%s2231_s5 + $0xe8] sm:$0xff]  ;;  %v1372_v49 = vpack.c.bf16 %v841_v47, %v840_v46 }
 0x14d   : > { %1395 = vmatprep.subr.bf16.mxu1 %v1394_v24  ;;  %v1370_v44 = vpack.c.bf16 %v857_v41, %v856_v39 }
 0x14f   : > { %1361 = vmatpush3.bf16.msra.mxu0 %v1360_v48  ;;  %v872_v48 = vld [vmem:[%s2231_s5 + $0x160] sm:$0xff] }
 0x150   : > { %1363 = vmatprep.subr.bf16.mxu0 %v1362_v19  ;;  %1397 = vmatpush3.bf16.msra.mxu1 %v1396_v28  ;;  %v1404_v53 = vpack.c.bf16 %v873_v50, %v872_v48 }
 0x151   : > { %1399 = vmatprep.subr.bf16.mxu1 %v1398_v35 }
 0x153   : > { %1365 = vmatpush3.bf16.msra.mxu0 %v1364_v25 }
 0x154   : > { %1367 = vmatprep.subr.bf16.mxu0 %v1366_v23  ;;  %1401 = vmatpush3.bf16.msra.mxu1 %v1400_v40 }
 0x155   : > { %1403 = vmatprep.subr.bf16.mxu1 %v1402_v45 }
 0x157   : > { %1369 = vmatpush3.bf16.msra.mxu0 %v1368_v36 }
 0x158   : > { %1371 = vmatprep.subr.bf16.mxu0 %v1370_v44  ;;  %1405 = vmatpush3.bf16.msra.mxu1 %v1404_v53 }
 0x15b   : > { %1373 = vmatpush3.bf16.msra.mxu0 %v1372_v49 }
 0x15c   : > { %1375 = vmatprep.subr.bf16.mxu0 %v1374_v54 }
 0x212   : > { %v803_v0 = vpop.f32.mrb[0].mxu1 }
 0x213   : > { %v2056_v2 = vadd.f32 %v803_v0, %v657_v59  ;;  %v805_v3 = vpop.f32.mrb[1].mxu1  ;;  %v843_v59 = vld [vmem:[%s2231_s5 + $0x78] sm:$0xff] }
 0x214   : > { %v2060_v5 = vadd.f32 %v805_v3, %v661_v60  ;;  %v874_v60 = vld [vmem:[%s2231_s5 + $0x170] sm:$0xff] }
 0x215   : > { %v732_v61 = vpop.f32.mrb[0].mxu0  ;;  %v810_v7 = vmul.f32 %v2056_v2, %v2056_v2 }
 0x216   : > { %v2052_v62 = vadd.f32 %v732_v61, %v649_v57  ;;  %v734_v63 = vpop.f32.mrb[1].mxu0  ;;  %v811_v10 = vmul.f32 %v2060_v5, %v2060_v5  ;;  %v842_v57 = vld [vmem:[%s2231_s5 + $0x70] sm:$0xff]  ;;  %v875_v61 = vld [vmem:[%s2231_s5 + $0x178] sm:$0xff] }
 0x217   : > { %v2054_v1 = vadd.f32 %v734_v63, %v653_v58  ;;  %v816_v11 = vsel %vm812_vm4, %v810_v7, 0.0  ;;  %v1406_v58 = vpack.c.bf16 %v891_v56, %v890_v55  ;;  %v1376_v63 = vpack.c.bf16 %v843_v59, %v842_v57 }
 0x218   : > { %v808_v4 = vmul.f32 %v2052_v62, %v2052_v62  ;;  %v818_v14 = vsel %vm812_vm4, %v811_v10, 0.0  ;;  %v1408_v0 = vpack.c.bf16 %v875_v61, %v874_v60 }
 0x219   : > { %v809_v6 = vmul.f32 %v2054_v1, %v2054_v1  ;;  %1407 = vmatprep.subr.bf16.mxu1 %v1406_v58  ;;  %1377 = vmatpush3.bf16.msra.mxu0 %v1376_v63 }
 0x21a   : > { %v813_v8 = vsel %vm812_vm4, %v808_v4, 0.0  ;;  %1409 = vmatpush3.bf16.msra.mxu1 %v1408_v0 }
 0x21b   : > { %v814_v9 = vsel %vm812_vm4, %v809_v6, 0.0 }
 0x21c   : > { %v815_v12 = vadd.f32 %v814_v9, %v813_v8 }
 0x21e   : > { %v817_v13 = vadd.f32 %v816_v11, %v815_v12 }
 0x220   : > { %v819_v15 = vadd.f32 %v818_v14, %v817_v13  ;;  %v892_v13 = vld [vmem:[%s2232_s6] sm:$0x1] }
 0x222   : > { %820 = vadd.xlane.f32.xlu0 %v819_v15 }
 0x2af   : > { %v821_v3 = vpop.xlane.xlu0 %820 }
 0x2b0   : > { %v822_v4 = vmax.f32 %v821_v3, 1e-24 }
 0x2b2   : > { %1488 = vrsqrt.f32 %v822_v4 }
 0x2bc   : > { %v1489_v6 = vpop.eup %1488 }
 0x2bd   : > { %v825_v7 = vmul.f32 %v1489_v6, %v2054_v1  ;;  %v827_v8 = vmul.f32 %v1489_v6, %v2060_v5  ;;  %v824_v9 = vmul.f32 %v1489_v6, %v2052_v62  ;;  %v826_v10 = vmul.f32 %v1489_v6, %v2056_v2 }
 0x2bf   : > { %957 = vmatprep.mubr.f32.mxu0 %v825_v7  ;;  %1027 = vmatprep.mubr.f32.mxu1 %v827_v8 }
 0x2c0   : > { %958 = vmatmul.mubr.f32.vlgmr.msra.gmra.mrb[2].mxu0 %v824_v9  ;;  %1028 = vmatmul.mubr.f32.vlgmr.msra.gmra.mrb[2].mxu1 %v826_v10 }
 0x393   : > { %v1202_v11 = vpop.f32.mrb[2].mxu0  ;;  %v1237_v12 = vpop.f32.mrb[2].mxu1 }
 0x394   : > { %v1203_v14 = vpop.f32.mrb[3].mxu0  ;;  %v1238_v15 = vpop.f32.mrb[3].mxu1 }
 0x395   : > { %v1204_v1 = vadd.f32 %v1203_v14, %v1202_v11  ;;  %v1239_v16 = vadd.f32 %v1238_v15, %v1237_v12 }
 0x397   : > { %v960_v5 = vadd.f32 %v1204_v1, %v892_v13 }
 0x399   : > { %v1030_v17 = vadd.f32 %v1239_v16, %v960_v5 }
 0x39b   : > { %1033 = vst [vmem:[%s1710_s16] sm:$0x1] %v1030_v17 }
 0x39c PF: > { %s1147_s9 = sshll.u32 %s1572_s28, 4  ;;  %s1047_s10 = sshll.u32 %s1710_s16, 4  ;;  %s1048_s10 = int_to_ptr.vmem [resolvable:$true] %s1047_s10 }
 0x39d   : > { %s2176_s12 = scalar_lea.hbm %s2233_s7, %s1147_s9  ;;  %s1035_s15 = scalar_lea.sflag [#allocation4], %s292_s18 }
 0x39e   : > { %s1490_s19 = scalar_lea.vmem %s1048_s10, 16  ;;  %s1589_s20 = smov [#allocation3]  }
 0x39f   : > { %p1491_p2 = scmp.ne.s32.totalorder %s1048_s10, %s1490_s19  ;;  %s1494_s21 = sshll.u32 %s1589_s20, 4  ;;  %s1495_s21 = int_to_ptr.vmem [resolvable:$false] %s1494_s21 }
 0x3a0   : > { %s1496_s22 = scalar_lea.vmem %s1495_s21, 32  ;;  %p1497_p6 = scmp.lt.s32.totalorder %s1048_s10, %s1495_s21 }
 0x3a1   : > { %p1492_p4 = pnand %p1491_p2, %p1679_p3  ;;  %p1498_p7 = scmp.lt.s32.totalorder %s1496_s22, %s1490_s19 }
 0x3a3   : > { %p1493_p5 = pneg %p1492_p4  ;;  %p1499_p8 = por %p1498_p7, %p1497_p6 }
 0x3a5   : > { %p1500_p10 = pnand %p1499_p8, %p1493_p5 }
 0x3a7   : > { %1503 = shalt.err (!%p1500_p10)
}
 0x3a8   : > { %s1504_s28 = scalar_lea.hbm %s2176_s12, 16  ;;  %s1508_s23 = scalar_lea.hbm %s2233_s7, 32 }
 0x3a9   : > { %p1505_p11 = scmp.ne.s32.totalorder %s2176_s12, %s1504_s28  ;;  %p1509_p0 = scmp.lt.u32.totalorder %s2176_s12, %s2233_s7 }
 0x3aa   : > { %p1510_p1 = scmp.lt.u32.totalorder %s1508_s23, %s1504_s28  ;;  %p1512_p4 = scmp.lt.u32.totalorder %s1504_s28, %s2176_s12 }
 0x3ab   : > { %p1506_p12 = pnand %p1505_p11, %p1679_p3 }
 0x3ac   : > { %p1511_p2 = por %p1510_p1, %p1509_p0 }
 0x3ad   : > { %p1507_p13 = pneg %p1506_p12 }
 0x3ae   : > { %p1513_p5 = por %p1512_p4, %p1511_p2 }
 0x3b0   : > { %p1514_p6 = pnand %p1513_p5, %p1507_p13 }
 0x3b2   : > { %1517 = shalt.err (!%p1514_p6)
}
 0x3b3   : > { %1414 = dma.vmem_to_hbm [thread:$0]  (%p1679_p3), %s1048_s10, 16, %s2176_s12, %s1035_s15  }
 0x3b4 PF: > { %p1420_p7 = scmp.ge.s32.totalorder %s1584_s8, 2  ;;  %s1059_s27 = sand.u32 1, %s1556_s24  }
 0x3b5   : > { %s1060_s19 = scalar_lea.sflag [#allocation4], %s1059_s27 }
 0x3b6   : > { %p1417_p8 = pnand %p1420_p7, %p1689_p9 }
 0x3b8   : > { %1551 = dma.done.wait (!%p1417_p8), %s1060_s19, 16  }
 0x3b9   : > { %1553 = vsyncadd (!%p1417_p8), %s1060_s19, 4294967280  ;;  %s20_s8 = sadd.s32 1, %s1584_s8   ;;  %s2239_s13 = sld [smem:[#allocation6_spill]] }
 0x3ba   : > { %p17_p10 = scmp.ge.s32.totalorder %s20_s8, 6   ;;  %s2240_s12 = sld [smem:[#allocation7_spill]] }
 0x3bb   : > { %s2241_s24 = smov %s1560_s25  ;;  %s2242_s25 = smov %s1564_s26 }
 0x3bc   : > { %s2243_s26 = smov %s1697_s17  ;;  %s2244_s27 = smov %s1576_s29 }
 0x3bd   : > { %s2245_s28 = smov %s1580_s30  ;;  %19 = sbr.rel (!%p17_p10) target bundleno = 5 (0x5), region = 91 }
 0x3bf   : > { %s2246_s29 = smov %s2239_s13 }
 0x3c0   : > { %s2247_s30 = smov %s2240_s12 }
 0x3c4   :  { %1064 = vsyncpa [#allocation4], 1 }
 0x3c5   :  { %1066 = vsyncpa [#allocation4 + $0x1], 1 }

</bundles_post_ra>
